<compile_context>
chip_gen: v7x
topology: tpu7x:2x2x1
jax: 0.10.0
libtpu: 0.0.40
codegen_flags: <defaults>
</compile_context>

<pallas_src>
import jax
import jax.numpy as jnp
from jax.experimental import pallas as pl
from jax.experimental.pallas import tpu as pltpu

# Small shapes consistent with the module.
B = 2          # sz_b
L = 8          # len_q = len_k = len_v
DM = 32        # d_model
H = 4          # n_head
DK = 8         # d_k
DV = 8         # d_v
HDK = H * DK
HDV = H * DV
BL = B * L
TEMP = float(DK) ** 0.5
LN_EPS = 1e-5  # PyTorch nn.LayerNorm default


def _mha_kernel(q_ref, k_ref, v_ref,
                wqkv_ref, bqkv_ref, wfc_ref, bfc_ref, gamma_ref, beta_ref,
                out_ref, attn_ref):
    q = q_ref[...]                                            # (BL, DM)  (residual too)

    # ---- fused Q/K/V projection: one MXU sequence on (3*BL, DM) x (DM, 3*HDK) ----
    x_all = jnp.concatenate([q, k_ref[...], v_ref[...]], axis=0)        # (3BL, DM)
    proj = jnp.dot(x_all, wqkv_ref[...],
                   preferred_element_type=jnp.float32) + bqkv_ref[...]  # (3BL, 3HDK)
    # only the diagonal blocks are meaningful:
    #   qp = proj[0:BL,       0:HDK      ]   (temperature already folded into wq)
    #   kp = proj[BL:2BL,     HDK:2HDK   ]
    #   vp = proj[2BL:3BL,    2HDK:3HDK  ]

    attn_tiles = []   # per-head (BL, L) softmax tiles, register-resident
    ctx_tiles = []    # per-head (BL, DV) context tiles, register-resident
    for h in range(H):
        # one full-batch column block per head; batch dim handled by dot_general batching
        qh = proj[0:BL,        h * DK:(h + 1) * DK].reshape(B, L, DK)
        kh = proj[BL:2 * BL,   HDK + h * DK:HDK + (h + 1) * DK].reshape(B, L, DK)
        vh = proj[2 * BL:3 * BL, 2 * HDK + h * DV:2 * HDK + (h + 1) * DV].reshape(B, L, DV)

        s = jnp.einsum('bqd,bkd->bqk', qh, kh,
                       preferred_element_type=jnp.float32)              # (B, L, L)
        s = s - jnp.max(s, axis=-1, keepdims=True)                      # stable softmax
        e = jnp.exp(s)
        p = e * pl.reciprocal(jnp.sum(e, axis=-1, keepdims=True), approx=True)
        attn_tiles.append(p.reshape(BL, L))

        ctx = jnp.einsum('bqk,bkd->bqd', p, vh,
                         preferred_element_type=jnp.float32)            # (B, L, DV)
        ctx_tiles.append(ctx.reshape(BL, DV))

    # single lane-dense store of all attention probabilities (wrapper re-layouts)
    attn_ref[...] = jnp.concatenate(attn_tiles, axis=1)                 # (BL, H*L)

    # register-resident context, head-major columns (matches fc weight row order)
    ctx_all = jnp.concatenate(ctx_tiles, axis=1)                        # (BL, HDV)

    # ---- output projection + residual + LayerNorm (whole batch) ----
    o = jnp.dot(ctx_all, wfc_ref[...],
                preferred_element_type=jnp.float32) + bfc_ref[...]      # (BL, DM)
    xr = o + q
    mu = jnp.mean(xr, axis=-1, keepdims=True)
    xc = xr - mu
    var = jnp.mean(xc * xc, axis=-1, keepdims=True)
    y = xc * jax.lax.rsqrt(var + LN_EPS)
    out_ref[...] = y * gamma_ref[...] + beta_ref[...]


def mha_forward(q, k, v, params):
    """q, k, v: (B, L, DM) float32.  params: pre-fused / pre-transposed weights."""
    q2 = q.reshape(BL, DM)
    k2 = k.reshape(BL, DM)
    v2 = v.reshape(BL, DM)

    def full2d(shape):
        return pl.BlockSpec(shape, lambda i: (0, 0))

    out2, attn2 = pl.pallas_call(
        _mha_kernel,
        out_shape=(
            jax.ShapeDtypeStruct((BL, DM), jnp.float32),
            jax.ShapeDtypeStruct((BL, H * L), jnp.float32),
        ),
        grid_spec=pltpu.PrefetchScalarGridSpec(
            num_scalar_prefetch=0,
            grid=(1,),
            in_specs=[
                full2d((BL, DM)), full2d((BL, DM)), full2d((BL, DM)),
                full2d((DM, 3 * HDK)), full2d((1, 3 * HDK)),
                full2d((HDV, DM)), full2d((1, DM)),
                full2d((1, DM)), full2d((1, DM)),
            ],
            out_specs=[
                full2d((BL, DM)),
                full2d((BL, H * L)),
            ],
        ),
        compiler_params=pltpu.CompilerParams(
            dimension_semantics=("arbitrary",),
        ),
    )(q2, k2, v2,
      params["w_qkv"], params["b_qkv"],
      params["wfc_t"], params["bfc"], params["gamma"], params["beta"])

    out = out2.reshape(B, L, DM)
    # (BL, H*L) -> head-major (n_head*sz_b, len_q, len_k), as the module returns.
    attn = attn2.reshape(B, L, H, L).transpose(2, 0, 1, 3).reshape(H * B, L, L)
    return out, attn


def reference(q, k, v, wq, bq, wk, bk, wv, bv, wfc, bfc, gamma, beta):
    """Pure-JAX f32 mirror of the PyTorch forward (eval mode, mask=None)."""
    prec = jax.lax.Precision.HIGHEST
    residual = q
    qp = jnp.einsum("bld,ed->ble", q, wq, precision=prec) + bq
    kp = jnp.einsum("bld,ed->ble", k, wk, precision=prec) + bk
    vp = jnp.einsum("bld,ed->ble", v, wv, precision=prec) + bv

    def split_heads(x, dh):
        # (B, L, H*dh) -> (H*B, L, dh), head-major as in the module's permute/view
        return x.reshape(B, L, H, dh).transpose(2, 0, 1, 3).reshape(H * B, L, dh)

    qh = split_heads(qp, DK)
    kh = split_heads(kp, DK)
    vh = split_heads(vp, DV)
    s = jnp.einsum("nqd,nkd->nqk", qh, kh, precision=prec) / TEMP
    attn = jax.nn.softmax(s, axis=2)
    o = jnp.einsum("nqk,nkd->nqd", attn, vh, precision=prec)
    o = o.reshape(H, B, L, DV).transpose(1, 2, 0, 3).reshape(B, L, HDV)
    o = jnp.einsum("ble,de->bld", o, wfc, precision=prec) + bfc
    x = o + residual
    mu = x.mean(-1, keepdims=True)
    var = ((x - mu) ** 2).mean(-1, keepdims=True)
    y = (x - mu) / jnp.sqrt(var + LN_EPS)
    return y * gamma + beta, attn


if __name__ == "__main__":
    key = jax.random.PRNGKey(0)
    ks = jax.random.split(key, 10)

    q = jax.random.normal(ks[0], (B, L, DM), jnp.float32)
    k = jax.random.normal(ks[1], (B, L, DM), jnp.float32)
    v = jax.random.normal(ks[2], (B, L, DM), jnp.float32)

    # Parameter init mirroring the module's __init__ (PyTorch (out, in) layout).
    std_qk = (2.0 / (DM + DK)) ** 0.5
    std_v = (2.0 / (DM + DV)) ** 0.5
    std_fc = (2.0 / (HDV + DM)) ** 0.5          # xavier_normal_
    wq = std_qk * jax.random.normal(ks[3], (HDK, DM), jnp.float32)
    wk = std_qk * jax.random.normal(ks[4], (HDK, DM), jnp.float32)
    wv = std_v * jax.random.normal(ks[5], (HDV, DM), jnp.float32)
    wfc = std_fc * jax.random.normal(ks[6], (DM, HDV), jnp.float32)
    bq = 0.02 * jax.random.normal(ks[7], (HDK,), jnp.float32)
    bk = 0.02 * jax.random.normal(ks[8], (HDK,), jnp.float32)
    bv = 0.02 * jax.random.normal(ks[9], (HDV,), jnp.float32)
    bfc = jnp.zeros((DM,), jnp.float32)
    gamma = jnp.ones((DM,), jnp.float32)
    beta = jnp.zeros((DM,), jnp.float32)

    # One-time setup, outside the per-call path:
    #   * weights pre-transposed to (in, out) so every matmul output is lane-dense,
    #   * Q/K/V weights fused column-wise into a single (DM, 3*HDK) operand,
    #   * 1/sqrt(d_k) temperature folded into wq / bq.
    inv_temp = 1.0 / TEMP
    w_qkv = jnp.concatenate([wq.T * inv_temp, wk.T, wv.T], axis=1)      # (DM, 3*HDK)
    b_qkv = jnp.concatenate([bq * inv_temp, bk, bv]).reshape(1, 3 * HDK)
    params = dict(
        w_qkv=w_qkv, b_qkv=b_qkv,
        wfc_t=wfc.T, bfc=bfc.reshape(1, DM),
        gamma=gamma.reshape(1, DM), beta=beta.reshape(1, DM),
    )

    out, attn = mha_forward(q, k, v, params)
    out = jax.block_until_ready(out)
    attn = jax.block_until_ready(attn)

    ref_out, ref_attn = reference(q, k, v, wq, bq, wk, bk, wv, bv, wfc, bfc,
                                  gamma, beta)
    ref_out = jax.block_until_ready(ref_out)

    assert out.shape == (B, L, DM), out.shape
    assert attn.shape == (H * B, L, L), attn.shape
    assert bool(jnp.all(jnp.isfinite(out)))
    assert bool(jnp.allclose(attn, ref_attn, rtol=2e-2, atol=2e-2)), (
        float(jnp.max(jnp.abs(attn - ref_attn)))
    )
    assert bool(jnp.allclose(out, ref_out, rtol=2e-2, atol=2e-2)), (
        float(jnp.max(jnp.abs(out - ref_out)))
    )
    print("KERNEL_OK")
</pallas_src>

<mosaic_0001>
module attributes {stable_mosaic.version = 11 : i64} {
  func.func @_mha_kernel(%arg0: i32, %arg1: memref<16x32xf32, #tpu.memory_space<vmem>>, %arg2: memref<16x32xf32, #tpu.memory_space<vmem>>, %arg3: memref<16x32xf32, #tpu.memory_space<vmem>>, %arg4: memref<32x96xf32, #tpu.memory_space<vmem>>, %arg5: memref<1x96xf32, #tpu.memory_space<vmem>>, %arg6: memref<32x32xf32, #tpu.memory_space<vmem>>, %arg7: memref<1x32xf32, #tpu.memory_space<vmem>>, %arg8: memref<1x32xf32, #tpu.memory_space<vmem>>, %arg9: memref<1x32xf32, #tpu.memory_space<vmem>>, %arg10: memref<16x32xf32, #tpu.memory_space<vmem>>, %arg11: memref<16x32xf32, #tpu.memory_space<vmem>>) attributes {dimension_semantics = [#tpu.dimension_semantics<arbitrary>], iteration_bounds = array<i64: 1>, scalar_prefetch = 0 : i64, scratch_operands = 0 : i64, tpu.core_type = #tpu.core_type<tc>, window_params = [{pipeline_mode = #tpu.pipeline_mode<synchronous>, transform_indices = @transform_0, window_bounds = array<i64: 16, 32>}, {pipeline_mode = #tpu.pipeline_mode<synchronous>, transform_indices = @transform_1, window_bounds = array<i64: 16, 32>}, {pipeline_mode = #tpu.pipeline_mode<synchronous>, transform_indices = @transform_2, window_bounds = array<i64: 16, 32>}, {pipeline_mode = #tpu.pipeline_mode<synchronous>, transform_indices = @transform_3, window_bounds = array<i64: 32, 96>}, {pipeline_mode = #tpu.pipeline_mode<synchronous>, transform_indices = @transform_4, window_bounds = array<i64: 1, 96>}, {pipeline_mode = #tpu.pipeline_mode<synchronous>, transform_indices = @transform_5, window_bounds = array<i64: 32, 32>}, {pipeline_mode = #tpu.pipeline_mode<synchronous>, transform_indices = @transform_6, window_bounds = array<i64: 1, 32>}, {pipeline_mode = #tpu.pipeline_mode<synchronous>, transform_indices = @transform_7, window_bounds = array<i64: 1, 32>}, {pipeline_mode = #tpu.pipeline_mode<synchronous>, transform_indices = @transform_8, window_bounds = array<i64: 1, 32>}, {pipeline_mode = #tpu.pipeline_mode<synchronous>, transform_indices = @transform_9, window_bounds = array<i64: 16, 32>}, {pipeline_mode = #tpu.pipeline_mode<synchronous>, transform_indices = @transform_10, window_bounds = array<i64: 16, 32>}]} {
    %c0 = arith.constant 0 : index
    %c0_0 = arith.constant 0 : index
    %0 = vector.load %arg1[%c0, %c0_0] : memref<16x32xf32, #tpu.memory_space<vmem>>, vector<16x32xf32>
    %c0_1 = arith.constant 0 : index
    %c0_2 = arith.constant 0 : index
    %1 = vector.load %arg2[%c0_1, %c0_2] : memref<16x32xf32, #tpu.memory_space<vmem>>, vector<16x32xf32>
    %c0_3 = arith.constant 0 : index
    %c0_4 = arith.constant 0 : index
    %2 = vector.load %arg3[%c0_3, %c0_4] : memref<16x32xf32, #tpu.memory_space<vmem>>, vector<16x32xf32>
    %3 = tpu.concatenate %0, %1, %2 in 0 : vector<16x32xf32>, vector<16x32xf32>, vector<16x32xf32> -> vector<48x32xf32>
    %c0_5 = arith.constant 0 : index
    %c0_6 = arith.constant 0 : index
    %4 = vector.load %arg4[%c0_5, %c0_6] : memref<32x96xf32, #tpu.memory_space<vmem>>, vector<32x96xf32>
    %cst = arith.constant dense<0.000000e+00> : vector<48x96xf32>
    %5 = tpu.matmul %3, %4, %cst {dimension_numbers = #tpu.dot_dimension_numbers<[1], [0], [0], [1], [0, 0, 1, 1], [], []>} : vector<48x32xf32>, vector<32x96xf32>, vector<48x96xf32> -> vector<48x96xf32>
    %c0_7 = arith.constant 0 : index
    %c0_8 = arith.constant 0 : index
    %6 = vector.load %arg5[%c0_7, %c0_8] : memref<1x96xf32, #tpu.memory_space<vmem>>, vector<1x96xf32>
    %7 = vector.broadcast %6 : vector<1x96xf32> to vector<48x96xf32>
    %8 = arith.addf %5, %7 : vector<48x96xf32>
    %9 = vector.extract_strided_slice %8 {offsets = [0, 0], sizes = [16, 8], strides = [1, 1]} : vector<48x96xf32> to vector<16x8xf32>
    %10 = vector.shape_cast %9 : vector<16x8xf32> to vector<2x8x8xf32>
    %11 = vector.extract_strided_slice %8 {offsets = [16, 32], sizes = [16, 8], strides = [1, 1]} : vector<48x96xf32> to vector<16x8xf32>
    %12 = vector.shape_cast %11 : vector<16x8xf32> to vector<2x8x8xf32>
    %13 = vector.extract_strided_slice %8 {offsets = [32, 64], sizes = [16, 8], strides = [1, 1]} : vector<48x96xf32> to vector<16x8xf32>
    %14 = vector.shape_cast %13 : vector<16x8xf32> to vector<2x8x8xf32>
    "tpu.trace_start"() <{level = 10 : i32, message = "bqd,bkd->bqk"}> : () -> ()
    %cst_9 = arith.constant dense<0.000000e+00> : vector<2x8x8xf32>
    %15 = tpu.matmul %10, %12, %cst_9 {dimension_numbers = #tpu.dot_dimension_numbers<[2], [2], [1], [1], [0, 0, 0, 1, 1, 1], [0], [0]>} : vector<2x8x8xf32>, vector<2x8x8xf32>, vector<2x8x8xf32> -> vector<2x8x8xf32>
    "tpu.trace_stop"() : () -> ()
    %cst_10 = arith.constant dense<0xFF800000> : vector<2x8xf32>
    %16 = vector.multi_reduction <maximumf>, %15, %cst_10 [2] : vector<2x8x8xf32> to vector<2x8xf32>
    %17 = vector.shape_cast %16 : vector<2x8xf32> to vector<2x8x1xf32>
    %18 = vector.broadcast %17 : vector<2x8x1xf32> to vector<2x8x8xf32>
    %19 = arith.subf %15, %18 : vector<2x8x8xf32>
    %20 = math.exp %19 : vector<2x8x8xf32>
    %cst_11 = arith.constant dense<0.000000e+00> : vector<2x8xf32>
    %21 = vector.multi_reduction <add>, %20, %cst_11 [2] : vector<2x8x8xf32> to vector<2x8xf32>
    %22 = vector.shape_cast %21 : vector<2x8xf32> to vector<2x8x1xf32>
    %23 = tpu.reciprocal %22 {approx = true} : vector<2x8x1xf32> -> vector<2x8x1xf32>
    %24 = vector.broadcast %23 : vector<2x8x1xf32> to vector<2x8x8xf32>
    %25 = arith.mulf %20, %24 : vector<2x8x8xf32>
    %26 = vector.shape_cast %25 : vector<2x8x8xf32> to vector<16x8xf32>
    "tpu.trace_start"() <{level = 10 : i32, message = "bqk,bkd->bqd"}> : () -> ()
    %cst_12 = arith.constant dense<0.000000e+00> : vector<2x8x8xf32>
    %27 = tpu.matmul %25, %14, %cst_12 {dimension_numbers = #tpu.dot_dimension_numbers<[2], [1], [1], [2], [0, 0, 0, 1, 1, 2], [0], [0]>} : vector<2x8x8xf32>, vector<2x8x8xf32>, vector<2x8x8xf32> -> vector<2x8x8xf32>
    "tpu.trace_stop"() : () -> ()
    %28 = vector.shape_cast %27 : vector<2x8x8xf32> to vector<16x8xf32>
    %29 = vector.extract_strided_slice %8 {offsets = [0, 8], sizes = [16, 8], strides = [1, 1]} : vector<48x96xf32> to vector<16x8xf32>
    %30 = vector.shape_cast %29 : vector<16x8xf32> to vector<2x8x8xf32>
    %31 = vector.extract_strided_slice %8 {offsets = [16, 40], sizes = [16, 8], strides = [1, 1]} : vector<48x96xf32> to vector<16x8xf32>
    %32 = vector.shape_cast %31 : vector<16x8xf32> to vector<2x8x8xf32>
    %33 = vector.extract_strided_slice %8 {offsets = [32, 72], sizes = [16, 8], strides = [1, 1]} : vector<48x96xf32> to vector<16x8xf32>
    %34 = vector.shape_cast %33 : vector<16x8xf32> to vector<2x8x8xf32>
    "tpu.trace_start"() <{level = 10 : i32, message = "bqd,bkd->bqk"}> : () -> ()
    %cst_13 = arith.constant dense<0.000000e+00> : vector<2x8x8xf32>
    %35 = tpu.matmul %30, %32, %cst_13 {dimension_numbers = #tpu.dot_dimension_numbers<[2], [2], [1], [1], [0, 0, 0, 1, 1, 1], [0], [0]>} : vector<2x8x8xf32>, vector<2x8x8xf32>, vector<2x8x8xf32> -> vector<2x8x8xf32>
    "tpu.trace_stop"() : () -> ()
    %cst_14 = arith.constant dense<0xFF800000> : vector<2x8xf32>
    %36 = vector.multi_reduction <maximumf>, %35, %cst_14 [2] : vector<2x8x8xf32> to vector<2x8xf32>
    %37 = vector.shape_cast %36 : vector<2x8xf32> to vector<2x8x1xf32>
    %38 = vector.broadcast %37 : vector<2x8x1xf32> to vector<2x8x8xf32>
    %39 = arith.subf %35, %38 : vector<2x8x8xf32>
    %40 = math.exp %39 : vector<2x8x8xf32>
    %cst_15 = arith.constant dense<0.000000e+00> : vector<2x8xf32>
    %41 = vector.multi_reduction <add>, %40, %cst_15 [2] : vector<2x8x8xf32> to vector<2x8xf32>
    %42 = vector.shape_cast %41 : vector<2x8xf32> to vector<2x8x1xf32>
    %43 = tpu.reciprocal %42 {approx = true} : vector<2x8x1xf32> -> vector<2x8x1xf32>
    %44 = vector.broadcast %43 : vector<2x8x1xf32> to vector<2x8x8xf32>
    %45 = arith.mulf %40, %44 : vector<2x8x8xf32>
    %46 = vector.shape_cast %45 : vector<2x8x8xf32> to vector<16x8xf32>
    "tpu.trace_start"() <{level = 10 : i32, message = "bqk,bkd->bqd"}> : () -> ()
    %cst_16 = arith.constant dense<0.000000e+00> : vector<2x8x8xf32>
    %47 = tpu.matmul %45, %34, %cst_16 {dimension_numbers = #tpu.dot_dimension_numbers<[2], [1], [1], [2], [0, 0, 0, 1, 1, 2], [0], [0]>} : vector<2x8x8xf32>, vector<2x8x8xf32>, vector<2x8x8xf32> -> vector<2x8x8xf32>
    "tpu.trace_stop"() : () -> ()
    %48 = vector.shape_cast %47 : vector<2x8x8xf32> to vector<16x8xf32>
    %49 = vector.extract_strided_slice %8 {offsets = [0, 16], sizes = [16, 8], strides = [1, 1]} : vector<48x96xf32> to vector<16x8xf32>
    %50 = vector.shape_cast %49 : vector<16x8xf32> to vector<2x8x8xf32>
    %51 = vector.extract_strided_slice %8 {offsets = [16, 48], sizes = [16, 8], strides = [1, 1]} : vector<48x96xf32> to vector<16x8xf32>
    %52 = vector.shape_cast %51 : vector<16x8xf32> to vector<2x8x8xf32>
    %53 = vector.extract_strided_slice %8 {offsets = [32, 80], sizes = [16, 8], strides = [1, 1]} : vector<48x96xf32> to vector<16x8xf32>
    %54 = vector.shape_cast %53 : vector<16x8xf32> to vector<2x8x8xf32>
    "tpu.trace_start"() <{level = 10 : i32, message = "bqd,bkd->bqk"}> : () -> ()
    %cst_17 = arith.constant dense<0.000000e+00> : vector<2x8x8xf32>
    %55 = tpu.matmul %50, %52, %cst_17 {dimension_numbers = #tpu.dot_dimension_numbers<[2], [2], [1], [1], [0, 0, 0, 1, 1, 1], [0], [0]>} : vector<2x8x8xf32>, vector<2x8x8xf32>, vector<2x8x8xf32> -> vector<2x8x8xf32>
    "tpu.trace_stop"() : () -> ()
    %cst_18 = arith.constant dense<0xFF800000> : vector<2x8xf32>
    %56 = vector.multi_reduction <maximumf>, %55, %cst_18 [2] : vector<2x8x8xf32> to vector<2x8xf32>
    %57 = vector.shape_cast %56 : vector<2x8xf32> to vector<2x8x1xf32>
    %58 = vector.broadcast %57 : vector<2x8x1xf32> to vector<2x8x8xf32>
    %59 = arith.subf %55, %58 : vector<2x8x8xf32>
    %60 = math.exp %59 : vector<2x8x8xf32>
    %cst_19 = arith.constant dense<0.000000e+00> : vector<2x8xf32>
    %61 = vector.multi_reduction <add>, %60, %cst_19 [2] : vector<2x8x8xf32> to vector<2x8xf32>
    %62 = vector.shape_cast %61 : vector<2x8xf32> to vector<2x8x1xf32>
    %63 = tpu.reciprocal %62 {approx = true} : vector<2x8x1xf32> -> vector<2x8x1xf32>
    %64 = vector.broadcast %63 : vector<2x8x1xf32> to vector<2x8x8xf32>
    %65 = arith.mulf %60, %64 : vector<2x8x8xf32>
    %66 = vector.shape_cast %65 : vector<2x8x8xf32> to vector<16x8xf32>
    "tpu.trace_start"() <{level = 10 : i32, message = "bqk,bkd->bqd"}> : () -> ()
    %cst_20 = arith.constant dense<0.000000e+00> : vector<2x8x8xf32>
    %67 = tpu.matmul %65, %54, %cst_20 {dimension_numbers = #tpu.dot_dimension_numbers<[2], [1], [1], [2], [0, 0, 0, 1, 1, 2], [0], [0]>} : vector<2x8x8xf32>, vector<2x8x8xf32>, vector<2x8x8xf32> -> vector<2x8x8xf32>
    "tpu.trace_stop"() : () -> ()
    %68 = vector.shape_cast %67 : vector<2x8x8xf32> to vector<16x8xf32>
    %69 = vector.extract_strided_slice %8 {offsets = [0, 24], sizes = [16, 8], strides = [1, 1]} : vector<48x96xf32> to vector<16x8xf32>
    %70 = vector.shape_cast %69 : vector<16x8xf32> to vector<2x8x8xf32>
    %71 = vector.extract_strided_slice %8 {offsets = [16, 56], sizes = [16, 8], strides = [1, 1]} : vector<48x96xf32> to vector<16x8xf32>
    %72 = vector.shape_cast %71 : vector<16x8xf32> to vector<2x8x8xf32>
    %73 = vector.extract_strided_slice %8 {offsets = [32, 88], sizes = [16, 8], strides = [1, 1]} : vector<48x96xf32> to vector<16x8xf32>
    %74 = vector.shape_cast %73 : vector<16x8xf32> to vector<2x8x8xf32>
    "tpu.trace_start"() <{level = 10 : i32, message = "bqd,bkd->bqk"}> : () -> ()
    %cst_21 = arith.constant dense<0.000000e+00> : vector<2x8x8xf32>
    %75 = tpu.matmul %70, %72, %cst_21 {dimension_numbers = #tpu.dot_dimension_numbers<[2], [2], [1], [1], [0, 0, 0, 1, 1, 1], [0], [0]>} : vector<2x8x8xf32>, vector<2x8x8xf32>, vector<2x8x8xf32> -> vector<2x8x8xf32>
    "tpu.trace_stop"() : () -> ()
    %cst_22 = arith.constant dense<0xFF800000> : vector<2x8xf32>
    %76 = vector.multi_reduction <maximumf>, %75, %cst_22 [2] : vector<2x8x8xf32> to vector<2x8xf32>
    %77 = vector.shape_cast %76 : vector<2x8xf32> to vector<2x8x1xf32>
    %78 = vector.broadcast %77 : vector<2x8x1xf32> to vector<2x8x8xf32>
    %79 = arith.subf %75, %78 : vector<2x8x8xf32>
    %80 = math.exp %79 : vector<2x8x8xf32>
    %cst_23 = arith.constant dense<0.000000e+00> : vector<2x8xf32>
    %81 = vector.multi_reduction <add>, %80, %cst_23 [2] : vector<2x8x8xf32> to vector<2x8xf32>
    %82 = vector.shape_cast %81 : vector<2x8xf32> to vector<2x8x1xf32>
    %83 = tpu.reciprocal %82 {approx = true} : vector<2x8x1xf32> -> vector<2x8x1xf32>
    %84 = vector.broadcast %83 : vector<2x8x1xf32> to vector<2x8x8xf32>
    %85 = arith.mulf %80, %84 : vector<2x8x8xf32>
    %86 = vector.shape_cast %85 : vector<2x8x8xf32> to vector<16x8xf32>
    "tpu.trace_start"() <{level = 10 : i32, message = "bqk,bkd->bqd"}> : () -> ()
    %cst_24 = arith.constant dense<0.000000e+00> : vector<2x8x8xf32>
    %87 = tpu.matmul %85, %74, %cst_24 {dimension_numbers = #tpu.dot_dimension_numbers<[2], [1], [1], [2], [0, 0, 0, 1, 1, 2], [0], [0]>} : vector<2x8x8xf32>, vector<2x8x8xf32>, vector<2x8x8xf32> -> vector<2x8x8xf32>
    "tpu.trace_stop"() : () -> ()
    %88 = vector.shape_cast %87 : vector<2x8x8xf32> to vector<16x8xf32>
    %89 = tpu.concatenate %26, %46, %66, %86 in 1 : vector<16x8xf32>, vector<16x8xf32>, vector<16x8xf32>, vector<16x8xf32> -> vector<16x32xf32>
    %c0_25 = arith.constant 0 : index
    %c0_26 = arith.constant 0 : index
    %90 = vector.load %arg11[%c0_25, %c0_26] : memref<16x32xf32, #tpu.memory_space<vmem>>, vector<16x32xf32>
    tpu.vector_store %arg11[%c0_25, %c0_26], %89 {strides = array<i32>} : memref<16x32xf32, #tpu.memory_space<vmem>>, vector<16x32xf32>,
    %91 = tpu.concatenate %28, %48, %68, %88 in 1 : vector<16x8xf32>, vector<16x8xf32>, vector<16x8xf32>, vector<16x8xf32> -> vector<16x32xf32>
    %c0_27 = arith.constant 0 : index
    %c0_28 = arith.constant 0 : index
    %92 = vector.load %arg6[%c0_27, %c0_28] : memref<32x32xf32, #tpu.memory_space<vmem>>, vector<32x32xf32>
    %cst_29 = arith.constant dense<0.000000e+00> : vector<16x32xf32>
    %93 = tpu.matmul %91, %92, %cst_29 {dimension_numbers = #tpu.dot_dimension_numbers<[1], [0], [0], [1], [0, 0, 1, 1], [], []>} : vector<16x32xf32>, vector<32x32xf32>, vector<16x32xf32> -> vector<16x32xf32>
    %c0_30 = arith.constant 0 : index
    %c0_31 = arith.constant 0 : index
    %94 = vector.load %arg7[%c0_30, %c0_31] : memref<1x32xf32, #tpu.memory_space<vmem>>, vector<1x32xf32>
    %95 = vector.broadcast %94 : vector<1x32xf32> to vector<16x32xf32>
    %96 = arith.addf %93, %95 : vector<16x32xf32>
    %97 = arith.addf %96, %0 : vector<16x32xf32>
    %cst_32 = arith.constant dense<0.000000e+00> : vector<16xf32>
    %98 = vector.multi_reduction <add>, %97, %cst_32 [1] : vector<16x32xf32> to vector<16xf32>
    %99 = vector.shape_cast %98 : vector<16xf32> to vector<16x1xf32>
    %cst_33 = arith.constant 3.200000e+01 : f32
    %100 = vector.broadcast %cst_33 : f32 to vector<16x1xf32>
    %101 = arith.divf %99, %100 : vector<16x1xf32>
    %102 = vector.broadcast %101 : vector<16x1xf32> to vector<16x32xf32>
    %103 = arith.subf %97, %102 : vector<16x32xf32>
    %104 = arith.mulf %103, %103 : vector<16x32xf32>
    %cst_34 = arith.constant dense<0.000000e+00> : vector<16xf32>
    %105 = vector.multi_reduction <add>, %104, %cst_34 [1] : vector<16x32xf32> to vector<16xf32>
    %106 = vector.shape_cast %105 : vector<16xf32> to vector<16x1xf32>
    %cst_35 = arith.constant 3.200000e+01 : f32
    %107 = vector.broadcast %cst_35 : f32 to vector<16x1xf32>
    %108 = arith.divf %106, %107 : vector<16x1xf32>
    %cst_36 = arith.constant 9.99999974E-6 : f32
    %109 = vector.broadcast %cst_36 : f32 to vector<16x1xf32>
    %110 = arith.addf %108, %109 : vector<16x1xf32>
    %111 = math.rsqrt %110 : vector<16x1xf32>
    %112 = vector.broadcast %111 : vector<16x1xf32> to vector<16x32xf32>
    %113 = arith.mulf %103, %112 : vector<16x32xf32>
    %c0_37 = arith.constant 0 : index
    %c0_38 = arith.constant 0 : index
    %114 = vector.load %arg8[%c0_37, %c0_38] : memref<1x32xf32, #tpu.memory_space<vmem>>, vector<1x32xf32>
    %115 = vector.broadcast %114 : vector<1x32xf32> to vector<16x32xf32>
    %116 = arith.mulf %113, %115 : vector<16x32xf32>
    %c0_39 = arith.constant 0 : index
    %c0_40 = arith.constant 0 : index
    %117 = vector.load %arg9[%c0_39, %c0_40] : memref<1x32xf32, #tpu.memory_space<vmem>>, vector<1x32xf32>
    %118 = vector.broadcast %117 : vector<1x32xf32> to vector<16x32xf32>
    %119 = arith.addf %116, %118 : vector<16x32xf32>
    %c0_41 = arith.constant 0 : index
    %c0_42 = arith.constant 0 : index
    %120 = vector.load %arg10[%c0_41, %c0_42] : memref<16x32xf32, #tpu.memory_space<vmem>>, vector<16x32xf32>
    tpu.vector_store %arg10[%c0_41, %c0_42], %119 {strides = array<i32>} : memref<16x32xf32, #tpu.memory_space<vmem>>, vector<16x32xf32>,
    return
  }
  func.func @transform_0(%arg0: i32) -> (i32, i32) {
    %c0_i32 = arith.constant 0 : i32
    %c0_i32_0 = arith.constant 0 : i32
    %c0_i32_1 = arith.constant 0 : i32
    return %c0_i32, %c0_i32_0 : i32, i32
  }
  func.func @transform_1(%arg0: i32) -> (i32, i32) {
    %c0_i32 = arith.constant 0 : i32
    %c0_i32_0 = arith.constant 0 : i32
    %c0_i32_1 = arith.constant 0 : i32
    return %c0_i32, %c0_i32_0 : i32, i32
  }
  func.func @transform_2(%arg0: i32) -> (i32, i32) {
    %c0_i32 = arith.constant 0 : i32
    %c0_i32_0 = arith.constant 0 : i32
    %c0_i32_1 = arith.constant 0 : i32
    return %c0_i32, %c0_i32_0 : i32, i32
  }
  func.func @transform_3(%arg0: i32) -> (i32, i32) {
    %c0_i32 = arith.constant 0 : i32
    %c0_i32_0 = arith.constant 0 : i32
    %c0_i32_1 = arith.constant 0 : i32
    return %c0_i32, %c0_i32_0 : i32, i32
  }
  func.func @transform_4(%arg0: i32) -> (i32, i32) {
    %c0_i32 = arith.constant 0 : i32
    %c0_i32_0 = arith.constant 0 : i32
    %c0_i32_1 = arith.constant 0 : i32
    return %c0_i32, %c0_i32_0 : i32, i32
  }
  func.func @transform_5(%arg0: i32) -> (i32, i32) {
    %c0_i32 = arith.constant 0 : i32
    %c0_i32_0 = arith.constant 0 : i32
    %c0_i32_1 = arith.constant 0 : i32
    return %c0_i32, %c0_i32_0 : i32, i32
  }
  func.func @transform_6(%arg0: i32) -> (i32, i32) {
    %c0_i32 = arith.constant 0 : i32
    %c0_i32_0 = arith.constant 0 : i32
    %c0_i32_1 = arith.constant 0 : i32
    return %c0_i32, %c0_i32_0 : i32, i32
  }
  func.func @transform_7(%arg0: i32) -> (i32, i32) {
    %c0_i32 = arith.constant 0 : i32
    %c0_i32_0 = arith.constant 0 : i32
    %c0_i32_1 = arith.constant 0 : i32
    return %c0_i32, %c0_i32_0 : i32, i32
  }
  func.func @transform_8(%arg0: i32) -> (i32, i32) {
    %c0_i32 = arith.constant 0 : i32
    %c0_i32_0 = arith.constant 0 : i32
    %c0_i32_1 = arith.constant 0 : i32
    return %c0_i32, %c0_i32_0 : i32, i32
  }
  func.func @transform_9(%arg0: i32) -> (i32, i32) {
    %c0_i32 = arith.constant 0 : i32
    %c0_i32_0 = arith.constant 0 : i32
    %c0_i32_1 = arith.constant 0 : i32
    return %c0_i32, %c0_i32_0 : i32, i32
  }
  func.func @transform_10(%arg0: i32) -> (i32, i32) {
    %c0_i32 = arith.constant 0 : i32
    %c0_i32_0 = arith.constant 0 : i32
    %c0_i32_1 = arith.constant 0 : i32
    return %c0_i32, %c0_i32_0 : i32, i32
  }
}

</mosaic_0001>

<bundles_post_ra>
// kernel: tpu_custom_call.1
= control target key start
LH: loop header
LB: loop body
LE: loop exit
PB: predicated region body
PF: predicated region fallthrough
CT: control target
= control target key end

     0   :  { %16 = vsyncpa [#allocation3], 0  ;;  %s2646_s0 = inlined_call_operand.hbm [shape: f32[16,32], index: 0, kind: input, shape index: {}]   ;;  %s2647_s1 = inlined_call_operand.hbm [shape: f32[16,32], index: 1, kind: input, shape index: {}]   ;;  %s2648_s2 = inlined_call_operand.hbm [shape: f32[16,32], index: 2, kind: input, shape index: {}]   ;;  %s2649_s3 = inlined_call_operand.hbm [shape: f32[32,96], index: 3, kind: input, shape index: {}]   ;;  %s2650_s4 = inlined_call_operand.vmem [shape: f32[1,96], index: 4, kind: input, shape index: {}]   ;;  %s2651_s5 = inlined_call_operand.hbm [shape: f32[32,32], index: 5, kind: input, shape index: {}]   ;;  %s2652_s6 = inlined_call_operand.vmem [shape: f32[1,32], index: 6, kind: input, shape index: {}]   ;;  %s2653_s7 = inlined_call_operand.vmem [shape: f32[1,32], index: 7, kind: input, shape index: {}]   ;;  %s2654_s8 = inlined_call_operand.vmem [shape: f32[1,32], index: 8, kind: input, shape index: {}]   ;;  %s2655_s9 = inlined_call_operand.hbm [shape: f32[16,32], index: 9, kind: output, shape index: {0}]   ;;  %s2656_s10 = inlined_call_operand.hbm [shape: f32[16,32], index: 10, kind: output, shape index: {1}]  }
   0x1   :  { %17 = vsyncpa [#allocation6], 0 }
   0x2   :  { %18 = vsyncpa [#allocation9], 0 }
   0x3   :  { %19 = vsyncpa [#allocation4], 0 }
   0x4   :  { %20 = vsyncpa [#allocation13], 0  ;;  %s2224_s13 = smov [#allocation5]   ;;  %s2225_s15 = smov [#allocation8]  }
   0x5   :  { %s38_s14 = sshll.u32 %s2224_s13, 4  ;;  %s62_s16 = sshll.u32 %s2225_s15, 4  ;;  %s39_s14 = int_to_ptr.vmem [resolvable:$true] %s38_s14  ;;  %s2303_s16 = int_to_ptr.vmem [resolvable:$true] %s62_s16 }
   0x6   :  { %s2060_s19 = scalar_lea.hbm %s2647_s1, 256 }
   0x7   :  { %p2061_p0 = scmp.ne.s32.totalorder %s2647_s1, %s2060_s19  ;;  %p2064_p1 = scmp.lt.u32.totalorder %s2060_s19, %s2647_s1 }
   0x9   :  { %p2066_p2 = pnand %p2064_p1, %p2061_p0 }
   0xb   :  { %2069 = shalt.err (!%p2066_p2)
}
   0xc   :  { %s2070_s24 = scalar_lea.vmem %s39_s14, 256  ;;  %p2075_p4 = scmp.lt.s32.totalorder %s39_s14, %s39_s14 }
   0xd   :  { %p2071_p3 = scmp.ne.s32.totalorder %s39_s14, %s2070_s24  ;;  %p2076_p5 = scmp.lt.s32.totalorder %s2070_s24, %s2070_s24 }
   0xf   :  { %p2077_p6 = por %p2076_p5, %p2075_p4 }
  0x11   :  { %p2078_p7 = pnand %p2077_p6, %p2071_p3 }
  0x13   :  { %2081 = shalt.err (!%p2078_p7)
}
  0x14   :  { %s2226_s25 = smov 128   ;;  %s2227_s26 = smov 8  }
  0x15   :  { %44 = dma.hbm_to_vmem [thread:$0]  %s2647_s1, 256, %s39_s14, [#allocation6], %s2226_s25, %s2226_s25, %s2227_s26  }
  0x16   :  { %s2082_s11 = scalar_lea.hbm %s2649_s3, 512 }
  0x17   :  { %p2083_p8 = scmp.ne.s32.totalorder %s2649_s3, %s2082_s11  ;;  %p2086_p9 = scmp.lt.u32.totalorder %s2082_s11, %s2649_s3 }
  0x19   :  { %p2088_p10 = pnand %p2086_p9, %p2083_p8 }
  0x1b   :  { %2091 = shalt.err (!%p2088_p10)
}
  0x1c   :  { %s2092_s18 = scalar_lea.vmem %s2303_s16, 512  ;;  %p2097_p12 = scmp.lt.s32.totalorder %s2303_s16, %s2303_s16 }
  0x1d   :  { %p2093_p11 = scmp.ne.s32.totalorder %s2303_s16, %s2092_s18  ;;  %p2098_p13 = scmp.lt.s32.totalorder %s2092_s18, %s2092_s18 }
  0x1f   :  { %p2099_p0 = por %p2098_p13, %p2097_p12 }
  0x21   :  { %p2100_p1 = pnand %p2099_p0, %p2093_p11 }
  0x23   :  { %2103 = shalt.err (!%p2100_p1)
}
  0x24   :  { %68 = dma.hbm_to_vmem [thread:$0]  %s2649_s3, 512, %s2303_s16, [#allocation9], %s2226_s25, %s2226_s25, %s2227_s26  }
  0x25   :  { %s2228_s19 = smov [#allocation2]   ;;  %s2229_s21 = smov [#allocation7]  }
  0x26   :  { %s26_s20 = sshll.u32 %s2228_s19, 4  ;;  %s50_s22 = sshll.u32 %s2229_s21, 4  ;;  %s27_s20 = int_to_ptr.vmem [resolvable:$true] %s26_s20  ;;  %s2340_s22 = int_to_ptr.vmem [resolvable:$true] %s50_s22 }
  0x27   :  { %s2104_s27 = scalar_lea.hbm %s2646_s0, 256 }
  0x28   :  { %p2105_p2 = scmp.ne.s32.totalorder %s2646_s0, %s2104_s27  ;;  %p2108_p3 = scmp.lt.u32.totalorder %s2104_s27, %s2646_s0 }
  0x2a   :  { %p2110_p4 = pnand %p2108_p3, %p2105_p2 }
  0x2c   :  { %2113 = shalt.err (!%p2110_p4)
}
  0x2d   :  { %s2114_s3 = scalar_lea.vmem %s27_s20, 256  ;;  %p2119_p6 = scmp.lt.s32.totalorder %s27_s20, %s27_s20 }
  0x2e   :  { %p2115_p5 = scmp.ne.s32.totalorder %s27_s20, %s2114_s3  ;;  %p2120_p7 = scmp.lt.s32.totalorder %s2114_s3, %s2114_s3 }
  0x30   :  { %p2121_p8 = por %p2120_p7, %p2119_p6 }
  0x32   :  { %p2122_p9 = pnand %p2121_p8, %p2115_p5 }
  0x34   :  { %2125 = shalt.err (!%p2122_p9)
}
  0x35   :  { %32 = dma.hbm_to_vmem [thread:$0]  %s2646_s0, 256, %s27_s20, [#allocation3], %s2226_s25, %s2226_s25, %s2227_s26  }
  0x36   :  { %s2126_s17 = scalar_lea.hbm %s2648_s2, 256 }
  0x37   :  { %p2127_p10 = scmp.ne.s32.totalorder %s2648_s2, %s2126_s17  ;;  %p2130_p11 = scmp.lt.u32.totalorder %s2126_s17, %s2648_s2 }
  0x39   :  { %p2132_p12 = pnand %p2130_p11, %p2127_p10 }
  0x3b   :  { %2135 = shalt.err (!%p2132_p12)
}
  0x3c   :  { %s2136_s21 = scalar_lea.vmem %s2340_s22, 256  ;;  %p2141_p0 = scmp.lt.s32.totalorder %s2340_s22, %s2340_s22 }
  0x3d   :  { %p2137_p13 = scmp.ne.s32.totalorder %s2340_s22, %s2136_s21  ;;  %p2142_p1 = scmp.lt.s32.totalorder %s2136_s21, %s2136_s21 }
  0x3f   :  { %p2143_p2 = por %p2142_p1, %p2141_p0 }
  0x41   :  { %p2144_p3 = pnand %p2143_p2, %p2137_p13 }
  0x43   :  { %2147 = shalt.err (!%p2144_p3)
}
  0x44   :  { %56 = dma.hbm_to_vmem [thread:$0]  %s2648_s2, 256, %s2340_s22, [#allocation6], %s2226_s25, %s2226_s25, %s2227_s26  }
  0x45   :  { %s2230_s23 = smov [#allocation10]   ;;  %s2148_s29 = scalar_lea.hbm %s2651_s5, 512 }
  0x46   :  { %s76_s24 = sshll.u32 %s2230_s23, 4  ;;  %p2149_p4 = scmp.ne.s32.totalorder %s2651_s5, %s2148_s29  ;;  %s77_s24 = int_to_ptr.vmem [resolvable:$true] %s76_s24 }
  0x47   :  { %p2152_p5 = scmp.lt.u32.totalorder %s2148_s29, %s2651_s5 }
  0x49   :  { %p2154_p6 = pnand %p2152_p5, %p2149_p4 }
  0x4b   :  { %2157 = shalt.err (!%p2154_p6)
}
  0x4c   :  { %s2158_s12 = scalar_lea.vmem %s77_s24, 512  ;;  %p2163_p8 = scmp.lt.s32.totalorder %s77_s24, %s77_s24 }
  0x4d   :  { %p2159_p7 = scmp.ne.s32.totalorder %s77_s24, %s2158_s12  ;;  %p2164_p9 = scmp.lt.s32.totalorder %s2158_s12, %s2158_s12 }
  0x4f   :  { %p2165_p10 = por %p2164_p9, %p2163_p8 }
  0x51   :  { %p2166_p11 = pnand %p2165_p10, %p2159_p7 }
  0x53   :  { %2169 = shalt.err (!%p2166_p11)
}
  0x54   :  { %82 = dma.hbm_to_vmem [thread:$0]  %s2651_s5, 512, %s77_s24, [#allocation9], %s2226_s25, %s2226_s25, %s2227_s26  }
  0x55   :  { %2214 = dma.done.wait [#allocation3], 256  }
  0x56   :  { %2215 = vsyncadd [#allocation3], 4294967040 }
  0x57   :  { %2216 = dma.done.wait [#allocation6], 512  }
  0x58   :  { %2217 = vsyncadd [#allocation6], 4294966784 }
  0x59   :  { %2218 = dma.done.wait [#allocation9], 1024  }
  0x5a   :  { %2219 = vsyncadd [#allocation9], 4294966272  ;;  %vm121_vm0 = vcmask 261120   ;;  %v110_v0 = vld [vmem:[#allocation8] sm:$0xff]  ;;  %v111_v1 = vld [vmem:[#allocation8 + $0x8] sm:$0xff]  ;;  %v2231_v10 = vmov 0.0  }
  0x5b   :  { %v112_v2 = vld [vmem:[#allocation8 + $0x10] sm:$0xff]  ;;  %v1984_v3 = vpack.c.bf16 %v111_v1, %v110_v0  ;;  %v113_v4 = vld [vmem:[#allocation8 + $0x18] sm:$0xff]  ;;  %v106_v8 = vld [vmem:[#allocation5] sm:$0xff]  ;;  %1893 = vmatprep.subr.mxu1 %v2231_v10  ;;  %vm2232_vm1 = vmmov 0   ;;  %s2233_s15 = smov 96   ;;  %vm238_vm2 = vcmask 64512  }
  0x5c   :  { %v2392_v5 = vld [vmem:[#allocation2] sm:$0xff]  ;;  %v1988_v6 = vpack.c.bf16 %v113_v4, %v112_v2  ;;  %v2396_v7 = vld [vmem:[#allocation2 + $0x8] sm:$0xff]  ;;  %v107_v9 = vld [vmem:[#allocation5 + $0x8] sm:$0xff]  ;;  %1895 = vmatprep.mubr.msk.f32.mxu1 %vm2232_vm1, %v2231_v10  ;;  %s2235_s17 = smov 88   ;;  %s2236_s18 = smov 120   ;;  %vm1581_vm3 = vcmask 195584  }
  0x5d   :  { %1884 = vmatprep.mubr.msk.f32.mxu0 %vm121_vm0, %v2392_v5  ;;  %1985 = vmatprep.subr.bf16.mxu0 %v1984_v3  ;;  %v108_v13 = vld [vmem:[#allocation7] sm:$0xff]  ;;  %v109_v14 = vld [vmem:[#allocation7 + $0x8] sm:$0xff]  ;;  %s2237_s1 = smov 56   ;;  %s2238_s14 = smov 80   ;;  %vm1578_vm4 = vcmask 130048  }
  0x5e   :  { %1987 = vmatpush3.bf16.msra.mxu0 %v1984_v3  ;;  %v1792_v16 = vld [vmem:[%s2650_s4] ss:$0 sm:$0xff]  ;;  %s2234_s4 = smov 64   ;;  %s2239_s19 = smov 112  }
  0x5f   :  { %1989 = vmatprep.subr.bf16.mxu0 %v1988_v6  ;;  %s2240_s21 = smov 48   ;;  %s2241_s0 = smov 72  }
  0x60   :  { %s2242_s20 = smov 104   ;;  %s2243_s23 = smov 40  }
  0x61   :  { %s2244_s24 = smov 16   ;;  %s2245_s27 = smov 24  }
  0x62   :  { %1991 = vmatpush3.bf16.msra.mxu0 %v1988_v6 }
  0x63   :  { %1923 = vmatprep.subr.mxu0 %v2231_v10 }
  0x65   :  { %1885 = vmatmul.mubr.msk.f32.vlgmr.msra.gmra.mrb[0].mxu0 %vm121_vm0, %v2396_v7 }
  0x66   :  { %1887 = vmatprep.mubr.msk.f32.mxu0 %vm121_vm0, %v106_v8 }
  0x69   :  { %1888 = vmatmul.mubr.msk.f32.gmra.mrb[2].mxu0 %vm121_vm0, %v107_v9 }
  0x6a   :  { %1890 = vmatprep.mubr.msk.f32.mxu0 %vm121_vm0, %v108_v13 }
  0x6d   :  { %1891 = vmatmul.mubr.msk.f32.gmra.mrb[4].mxu0 %vm121_vm0, %v109_v14 }
  0x6e   :  { %1925 = vmatprep.mubr.msk.f32.mxu0 %vm2232_vm1, %v2231_v10 }
 0x138   :  { %v1886_v11 = vpop.f32.mrb[0].mxu0 }
 0x139   :  { %v206_v12 = vpop.f32.mrb[1].mxu0  ;;  %v2428_v23 = vadd.f32 %v1886_v11, %v1792_v16 }
 0x13a   :  { %v2420_v21 = vadd.f32 %v1792_v16, %v206_v12 }
 0x13c   :  { %v1889_v15 = vpop.f32.mrb[2].mxu0 }
 0x13d   :  { %v216_v17 = vpop.f32.mrb[3].mxu0  ;;  %v2416_v19 = vadd.f32 %v1889_v15, %v1792_v16 }
 0x13e   :  { %v2413_v18 = vadd.f32 %v1792_v16, %v216_v17 }
 0x140   :  { %236 = vrot.lane.b32.xlu0 %v2413_v18, %s2233_s15  ;;  %v1892_v24 = vpop.f32.mrb[4].mxu0 }
 0x141   :  { %v226_v25 = vpop.f32.mrb[5].mxu0  ;;  %v2439_v33 = vadd.f32 %v1892_v24, %v1792_v16 }
 0x142   :  { %v2437_v32 = vadd.f32 %v1792_v16, %v226_v25 }
 0x144   :  { %315 = vrot.lane.b32.xlu0 %v2416_v19, %s2233_s15 }
 0x1b2   :  { %v237_v20 = vpop.permute.xlu0 %236 }
 0x1b3   :  { %1894 = vmatpush3.xpose.msk.msra.mxu1 %vm238_vm2, %v237_v20 }
 0x1b4   :  { %1898 = vmatprep.subr.mxu1 %v2231_v10 }
 0x1b6   :  { %v316_v22 = vpop.permute.xlu0 %315  ;;  %1896 = vmatmul.mubr.msk.f32.vlgmr.msra.gmra.mrb[0].mxu1 %vm238_vm2, %v2420_v21 }
 0x1b7   :  { %1899 = vmatpush3.xpose.msk.msra.mxu1 %vm238_vm2, %v316_v22  ;;  %1900 = vmatprep.mubr.msk.f32.mxu1 %vm2232_vm1, %v2231_v10 }
 0x1b8   :  { %1903 = vmatprep.subr.mxu1 %v2231_v10 }
 0x1ba   :  { %1901 = vmatmul.mubr.msk.f32.vlgmr.msra.gmra.mrb[2].mxu1 %vm238_vm2, %v2428_v23 }
 0x1bb   :  { %1905 = vmatprep.mubr.msk.f32.mxu1 %vm2232_vm1, %v2231_v10 }
 0x289   :  { %v310_v26 = vpop.f32.mrb[0].mxu1 }
 0x28a   :  { %v1897_v27 = vpop.f32.mrb[1].mxu1  ;;  %v392_v28 = vsel %vm238_vm2, %v310_v26, -inf }
 0x28b   :  { %393 = vmax.xlane.f32.xlu1 %v392_v28 }
 0x28d   :  { %v388_v29 = vpop.f32.mrb[2].mxu1 }
 0x28e   :  { %v1902_v30 = vpop.f32.mrb[3].mxu1  ;;  %v395_v31 = vsel %vm238_vm2, %v388_v29, -inf }
 0x28f   :  { %396 = vmax.xlane.f32.xlu1 %v395_v31 }
 0x2a0   :  { %415 = vrot.lane.b32.xlu1 %v2437_v32, %s2234_s4 }
 0x2a4   :  { %492 = vrot.lane.b32.xlu1 %v2439_v33, %s2234_s4 }
 0x2a8   :  { %570 = vrot.lane.b32.xlu1 %v2413_v18, %s2235_s17 }
 0x2ac   :  { %568 = vrot.lane.b32.xlu1 %v2420_v21, %s2236_s18 }
 0x318   :  { %v394_v34 = vpop.xlane.xlu1 %393 }
 0x319   :  { %v398_v35 = vsub.f32 %v310_v26, %v394_v34 }
 0x31b   :  { %v400_v36 = vmul.f32 1.442695, %v398_v35 }
 0x31c   :  { %v397_v37 = vpop.xlane.xlu1 %396 }
 0x31d   :  { %2024 = vpow2.f32 %v400_v36  ;;  %v399_v38 = vsub.f32 %v388_v29, %v397_v37 }
 0x31f   :  { %v402_v39 = vmul.f32 1.442695, %v399_v38 }
 0x320   :  { %v416_v40 = vpop.permute.xlu1 %415 }
 0x321   :  { %2026 = vpow2.f32 %v402_v39  ;;  %1904 = vmatpush3.msra.mxu1 %v416_v40 }
 0x322   :  { %1908 = vmatprep.subr.mxu1 %v2231_v10 }
 0x324   :  { %v493_v45 = vpop.permute.xlu1 %492 }
 0x327   :  { %v2025_v41 = vpop.eup %2024 }
 0x328   :  { %v404_v42 = vsel %vm238_vm2, %v2025_v41, 0.0  ;;  %v571_v46 = vpop.permute.xlu1 %570 }
 0x329   :  { %405 = vadd.xlane.f32.xlu0 %v404_v42 }
 0x32b   :  { %v2027_v43 = vpop.eup %2026 }
 0x32c   :  { %v407_v44 = vsel %vm238_vm2, %v2027_v43, 0.0  ;;  %v569_v47 = vpop.permute.xlu1 %568 }
 0x32d   :  { %408 = vadd.xlane.f32.xlu1 %v407_v44 }
 0x33e   :  { %646 = vrot.lane.b32.xlu1 %v2428_v23, %s2236_s18 }
 0x33f   :  { %648 = vrot.lane.b32.xlu0 %v2416_v19, %s2235_s17 }
 0x3b6   :  { %v406_v48 = vpop.xlane.xlu0 %405 }
 0x3b7   :  { %2028 = vrcp.f32 %v406_v48 }
 0x3ba   :  { %v409_v49 = vpop.xlane.xlu1 %408  ;;  %v649_v54 = vpop.permute.xlu0 %648 }
 0x3bb   :  { %2030 = vrcp.f32 %v409_v49 }
 0x3be   :  { %v647_v55 = vpop.permute.xlu1 %646 }
 0x3c1   :  { %v2029_v50 = vpop.eup %2028 }
 0x3c2   :  { %v2450_v51 = vmul.f32 %v2029_v50, %v2025_v41 }
 0x3c4   :  { %1906 = vmatmul.mubr.msk.f32.vlgmr.msra.gmra.mrb[4].mxu1 %vm238_vm2, %v2450_v51 }
 0x3c5   :  { %v2031_v52 = vpop.eup %2030  ;;  %1909 = vmatpush3.msra.mxu1 %v493_v45  ;;  %1910 = vmatprep.mubr.msk.f32.mxu1 %vm2232_vm1, %v2231_v10 }
 0x3c6   :  { %v2456_v53 = vmul.f32 %v2031_v52, %v2027_v43  ;;  %1913 = vmatprep.subr.mxu1 %v2231_v10 }
 0x3c8   :  { %1911 = vmatmul.mubr.msk.f32.vlgmr.msra.gmra.mrb[6].mxu1 %vm238_vm2, %v2456_v53 }
 0x3c9   :  { %1915 = vmatprep.mubr.msk.f32.mxu1 %vm2232_vm1, %v2231_v10 }
 0x3cc   :  { %1914 = vmatpush3.xpose.msk.msra.mxu1 %vm238_vm2, %v571_v46 }
 0x3cd   :  { %1918 = vmatprep.subr.mxu1 %v2231_v10 }
 0x3cf   :  { %1916 = vmatmul.mubr.msk.f32.vlgmr.msra.gmra.mrb[8].mxu1 %vm238_vm2, %v569_v47 }
 0x3d0   :  { %1919 = vmatpush3.xpose.msk.msra.mxu1 %vm238_vm2, %v649_v54  ;;  %1920 = vmatprep.mubr.msk.f32.mxu1 %vm2232_vm1, %v2231_v10 }
 0x3d1   :  { %1928 = vmatprep.subr.mxu1 %v2231_v10 }
 0x3d3   :  { %1921 = vmatmul.mubr.msk.f32.vlgmr.msra.gmra.mrb[10].mxu1 %vm238_vm2, %v647_v55 }
 0x3d4   :  { %1930 = vmatprep.mubr.msk.f32.mxu1 %vm2232_vm1, %v2231_v10 }
 0x497   :  { %v2473_v56 = vpop.f32.mrb[4].mxu1 }
 0x498   :  { %v1907_v57 = vpop.f32.mrb[5].mxu1 }
 0x49b   :  { %v2475_v58 = vpop.f32.mrb[6].mxu1 }
 0x49c   :  { %v1912_v59 = vpop.f32.mrb[7].mxu1 }
 0x4a2   :  { %v642_v60 = vpop.f32.mrb[8].mxu1 }
 0x4a3   :  { %v1917_v61 = vpop.f32.mrb[9].mxu1  ;;  %v724_v62 = vsel %vm238_vm2, %v642_v60, -inf }
 0x4a4   :  { %725 = vmax.xlane.f32.xlu1 %v724_v62 }
 0x4a6   :  { %v720_v63 = vpop.f32.mrb[10].mxu1 }
 0x4a7   :  { %v1922_v0 = vpop.f32.mrb[11].mxu1  ;;  %v727_v1 = vsel %vm238_vm2, %v720_v63, -inf }
 0x4a8   :  { %728 = vmax.xlane.f32.xlu0 %v727_v1 }
 0x4b5   :  { %746 = vrot.lane.b32.xlu1 %v2437_v32, %s2237_s1 }
 0x4b9   :  { %900 = vrot.lane.b32.xlu1 %v2413_v18, %s2238_s14 }
 0x4bd   :  { %978 = vrot.lane.b32.xlu1 %v2416_v19, %s2238_s14 }
 0x4be   :  { %822 = vrot.lane.b32.xlu0 %v2439_v33, %s2237_s1 }
 0x4c2   :  { %898 = vrot.lane.b32.xlu0 %v2420_v21, %s2239_s19 }
 0x531   :  { %v726_v2 = vpop.xlane.xlu1 %725 }
 0x532   :  { %v730_v3 = vsub.f32 %v642_v60, %v726_v2 }
 0x534   :  { %v732_v4 = vmul.f32 1.442695, %v730_v3 }
 0x535   :  { %v747_v6 = vpop.permute.xlu1 %746  ;;  %v729_v8 = vpop.xlane.xlu0 %728 }
 0x536   :  { %2032 = vpow2.f32 %v732_v4  ;;  %v731_v9 = vsub.f32 %v720_v63, %v729_v8  ;;  %1924 = vmatpush3.msra.mxu0 %v747_v6 }
 0x537   :  { %1933 = vmatprep.subr.mxu0 %v2231_v10 }
 0x538   :  { %v734_v11 = vmul.f32 1.442695, %v731_v9 }
 0x539   :  { %v823_v12 = vpop.permute.xlu0 %822  ;;  %v901_v17 = vpop.permute.xlu1 %900 }
 0x53a   :  { %2034 = vpow2.f32 %v734_v11  ;;  %1929 = vmatpush3.msra.mxu1 %v823_v12 }
 0x53b   :  { %1938 = vmatprep.subr.mxu1 %v2231_v10 }
 0x53d   :  { %v979_v20 = vpop.permute.xlu1 %978  ;;  %v899_v29 = vpop.permute.xlu0 %898 }
 0x540   :  { %v2033_v13 = vpop.eup %2032 }
 0x541   :  { %v736_v14 = vsel %vm238_vm2, %v2033_v13, 0.0 }
 0x542   :  { %737 = vadd.xlane.f32.xlu1 %v736_v14 }
 0x544   :  { %v2035_v15 = vpop.eup %2034 }
 0x545   :  { %v739_v16 = vsel %vm238_vm2, %v2035_v15, 0.0 }
 0x546   :  { %740 = vadd.xlane.f32.xlu1 %v739_v16 }
 0x557   :  { %976 = vrot.lane.b32.xlu1 %v2428_v23, %s2239_s19 }
 0x5cf   :  { %v738_v22 = vpop.xlane.xlu1 %737 }
 0x5d0   :  { %2036 = vrcp.f32 %v738_v22 }
 0x5d3   :  { %v741_v24 = vpop.xlane.xlu1 %740 }
 0x5d4   :  { %2038 = vrcp.f32 %v741_v24 }
 0x5d7   :  { %v977_v30 = vpop.permute.xlu1 %976 }
 0x5da   :  { %v2037_v25 = vpop.eup %2036 }
 0x5db   :  { %v2489_v26 = vmul.f32 %v2037_v25, %v2033_v13 }
 0x5dd   :  { %1926 = vmatmul.mubr.msk.f32.vlgmr.msra.gmra.mrb[6].mxu0 %vm238_vm2, %v2489_v26 }
 0x5de   :  { %v2039_v27 = vpop.eup %2038  ;;  %1934 = vmatpush3.xpose.msk.msra.mxu0 %vm238_vm2, %v901_v17  ;;  %1935 = vmatprep.mubr.msk.f32.mxu0 %vm2232_vm1, %v2231_v10 }
 0x5df   :  { %v2496_v28 = vmul.f32 %v2039_v27, %v2035_v15  ;;  %1943 = vmatprep.subr.mxu0 %v2231_v10 }
 0x5e1   :  { %1931 = vmatmul.mubr.msk.f32.vlgmr.msra.gmra.mrb[12].mxu1 %vm238_vm2, %v2496_v28  ;;  %1936 = vmatmul.mubr.msk.f32.vlgmr.msra.gmra.mrb[8].mxu0 %vm238_vm2, %v899_v29 }
 0x5e2   :  { %1939 = vmatpush3.xpose.msk.msra.mxu1 %vm238_vm2, %v979_v20  ;;  %1940 = vmatprep.mubr.msk.f32.mxu1 %vm2232_vm1, %v2231_v10 }
 0x5e3   :  { %1948 = vmatprep.subr.mxu1 %v2231_v10  ;;  %1945 = vmatprep.mubr.msk.f32.mxu0 %vm2232_vm1, %v2231_v10 }
 0x5e5   :  { %1941 = vmatmul.mubr.msk.f32.vlgmr.msra.gmra.mrb[14].mxu1 %vm238_vm2, %v977_v30 }
 0x5e6   :  { %1950 = vmatprep.mubr.msk.f32.mxu1 %vm2232_vm1, %v2231_v10 }
 0x6b0   :  { %v2511_v31 = vpop.f32.mrb[6].mxu0 }
 0x6b1   :  { %v1927_v34 = vpop.f32.mrb[7].mxu0 }
 0x6b4   :  { %v2513_v35 = vpop.f32.mrb[12].mxu1  ;;  %v972_v36 = vpop.f32.mrb[8].mxu0 }
 0x6b5   :  { %v1932_v37 = vpop.f32.mrb[13].mxu1  ;;  %v1937_v38 = vpop.f32.mrb[9].mxu0  ;;  %v1054_v39 = vsel %vm238_vm2, %v972_v36, -inf }
 0x6b6   :  { %1055 = vmax.xlane.f32.xlu0 %v1054_v39  ;;  %v1616_v38 = vld [vmem:[#allocation10] sm:$0xff] }
 0x6b8   :  { %v1050_v40 = vpop.f32.mrb[14].mxu1 }
 0x6b9   :  { %v1942_v41 = vpop.f32.mrb[15].mxu1  ;;  %v1057_v42 = vsel %vm238_vm2, %v1050_v40, -inf }
 0x6ba   :  { %1058 = vmax.xlane.f32.xlu1 %v1057_v42  ;;  %v1619_v41 = vld [vmem:[#allocation10 + $0x18] sm:$0xff] }
 0x6cb   :  { %1076 = vrot.lane.b32.xlu1 %v2437_v32, %s2240_s21 }
 0x6cc   :  { %1152 = vrot.lane.b32.xlu0 %v2439_v33, %s2240_s21 }
 0x6cf   :  { %1230 = vrot.lane.b32.xlu1 %v2413_v18, %s2241_s0 }
 0x6d3   :  { %1308 = vrot.lane.b32.xlu1 %v2416_v19, %s2241_s0 }
 0x6d7   :  { %1306 = vrot.lane.b32.xlu1 %v2428_v23, %s2242_s20 }
 0x743   :  { %v1056_v43 = vpop.xlane.xlu0 %1055 }
 0x744   :  { %v1060_v44 = vsub.f32 %v972_v36, %v1056_v43 }
 0x746   :  { %v1062_v45 = vmul.f32 1.442695, %v1060_v44 }
 0x747   :  { %v1153_v46 = vpop.permute.xlu0 %1152  ;;  %v1059_v47 = vpop.xlane.xlu1 %1058 }
 0x748   :  { %2040 = vpow2.f32 %v1062_v45  ;;  %v1061_v48 = vsub.f32 %v1050_v40, %v1059_v47  ;;  %1949 = vmatpush3.msra.mxu1 %v1153_v46  ;;  %v1618_v40 = vld [vmem:[#allocation10 + $0x10] sm:$0xff] }
 0x749   :  { %1958 = vmatprep.subr.mxu1 %v2231_v10  ;;  %v1996_v42 = vpack.c.bf16 %v1619_v41, %v1618_v40 }
 0x74a   :  { %v1064_v49 = vmul.f32 1.442695, %v1061_v48 }
 0x74b   :  { %v1077_v50 = vpop.permute.xlu1 %1076 }
 0x74c   :  { %2042 = vpow2.f32 %v1064_v49  ;;  %1944 = vmatpush3.msra.mxu0 %v1077_v50 }
 0x74d   :  { %1953 = vmatprep.subr.mxu0 %v2231_v10 }
 0x74f   :  { %v1231_v57 = vpop.permute.xlu1 %1230 }
 0x752   :  { %v2041_v18 = vpop.eup %2040 }
 0x753   :  { %v1066_v19 = vsel %vm238_vm2, %v2041_v18, 0.0  ;;  %v1309_v62 = vpop.permute.xlu1 %1308 }
 0x754   :  { %1067 = vadd.xlane.f32.xlu0 %v1066_v19 }
 0x756   :  { %v2043_v23 = vpop.eup %2042 }
 0x757   :  { %v1069_v52 = vsel %vm238_vm2, %v2043_v23, 0.0  ;;  %v1307_v0 = vpop.permute.xlu1 %1306 }
 0x758   :  { %1070 = vadd.xlane.f32.xlu0 %v1069_v52 }
 0x76e   :  { %1228 = vrot.lane.b32.xlu0 %v2420_v21, %s2242_s20 }
 0x7e1   :  { %v1068_v54 = vpop.xlane.xlu0 %1067 }
 0x7e2   :  { %2044 = vrcp.f32 %v1068_v54 }
 0x7e5   :  { %v1071_v55 = vpop.xlane.xlu0 %1070 }
 0x7e6   :  { %2046 = vrcp.f32 %v1071_v55 }
 0x7e9   :  { %v1229_v21 = vpop.permute.xlu0 %1228 }
 0x7ec   :  { %v2045_v59 = vpop.eup %2044 }
 0x7ed   :  { %v2527_v60 = vmul.f32 %v2045_v59, %v2041_v18 }
 0x7ef   :  { %1946 = vmatmul.mubr.msk.f32.vlgmr.msra.gmra.mrb[10].mxu0 %vm238_vm2, %v2527_v60 }
 0x7f0   :  { %v2047_v61 = vpop.eup %2046  ;;  %1954 = vmatpush3.xpose.msk.msra.mxu0 %vm238_vm2, %v1231_v57  ;;  %1955 = vmatprep.mubr.msk.f32.mxu0 %vm2232_vm1, %v2231_v10 }
 0x7f1   :  { %v2534_v63 = vmul.f32 %v2047_v61, %v2043_v23  ;;  %1963 = vmatprep.subr.mxu0 %v2231_v10 }
 0x7f3   :  { %1951 = vmatmul.mubr.msk.f32.vlgmr.msra.gmra.mrb[16].mxu1 %vm238_vm2, %v2534_v63  ;;  %1956 = vmatmul.mubr.msk.f32.vlgmr.msra.gmra.mrb[12].mxu0 %vm238_vm2, %v1229_v21 }
 0x7f4   :  { %1959 = vmatpush3.xpose.msk.msra.mxu1 %vm238_vm2, %v1309_v62  ;;  %1960 = vmatprep.mubr.msk.f32.mxu1 %vm2232_vm1, %v2231_v10 }
 0x7f5   :  { %1968 = vmatprep.subr.mxu1 %v2231_v10  ;;  %1965 = vmatprep.mubr.msk.f32.mxu0 %vm2232_vm1, %v2231_v10 }
 0x7f7   :  { %1961 = vmatmul.mubr.msk.f32.vlgmr.msra.gmra.mrb[18].mxu1 %vm238_vm2, %v1307_v0 }
 0x7f8   :  { %1970 = vmatprep.mubr.msk.f32.mxu1 %vm2232_vm1, %v2231_v10 }
 0x8c2   :  { %v1148_v1 = vpop.f32.mrb[10].mxu0 }
 0x8c3   :  { %v1947_v2 = vpop.f32.mrb[11].mxu0 }
 0x8c6   :  { %v1224_v3 = vpop.f32.mrb[16].mxu1  ;;  %v1302_v4 = vpop.f32.mrb[12].mxu0 }
 0x8c7   :  { %v1952_v6 = vpop.f32.mrb[17].mxu1  ;;  %v1957_v8 = vpop.f32.mrb[13].mxu0  ;;  %v1384_v9 = vsel %vm238_vm2, %v1302_v4, -inf }
 0x8c8   :  { %1385 = vmax.xlane.f32.xlu0 %v1384_v9 }
 0x8ca   :  { %v1380_v11 = vpop.f32.mrb[18].mxu1 }
 0x8cb   :  { %v1962_v12 = vpop.f32.mrb[19].mxu1  ;;  %v1387_v13 = vsel %vm238_vm2, %v1380_v11, -inf }
 0x8cc   :  { %1388 = vmax.xlane.f32.xlu1 %v1387_v13 }
 0x8dd   :  { %1406 = vrot.lane.b32.xlu1 %v2437_v32, %s2243_s23 }
 0x8e1   :  { %1588 = vrot.lane.b32.xlu1 %v2511_v31, %s2227_s26 }
 0x8e5   :  { %1590 = vrot.lane.b32.xlu1 %v2513_v35, %s2227_s26 }
 0x8e9   :  { %1598 = vrot.lane.b32.xlu1 %v1224_v3, %s2244_s24 }
 0x955   :  { %v1386_v10 = vpop.xlane.xlu0 %1385 }
 0x956   :  { %v1390_v14 = vsub.f32 %v1302_v4, %v1386_v10 }
 0x958   :  { %v1392_v15 = vmul.f32 1.442695, %v1390_v14 }
 0x959   :  { %v1389_v16 = vpop.xlane.xlu1 %1388 }
 0x95a   :  { %2048 = vpow2.f32 %v1392_v15  ;;  %v1391_v17 = vsub.f32 %v1380_v11, %v1389_v16 }
 0x95c   :  { %v1394_v20 = vmul.f32 1.442695, %v1391_v17 }
 0x95d   :  { %v1407_v22 = vpop.permute.xlu1 %1406 }
 0x95e   :  { %2050 = vpow2.f32 %v1394_v20  ;;  %1964 = vmatpush3.msra.mxu0 %v1407_v22 }
 0x961   :  { %v1589_v47 = vpop.permute.xlu1 %1588 }
 0x962   :  { %v1610_v50 = vsel %vm238_vm2, %v2473_v56, %v1589_v47  ;;  %v1823_v56 = vld [vmem:[%s2652_s6] ss:$0 sm:$0xff]  ;;  %s2246_s6 = smov [#allocation12]  }
 0x963   :  { %s1774_s30 = sshll.u32 %s2246_s6, 4  ;;  %s1775_s30 = int_to_ptr.vmem [resolvable:$true] %s1774_s30 }
 0x964   :  { %v2049_v32 = vpop.eup %2048  ;;  %s2170_s16 = scalar_lea.vmem %s1775_s30, 256  ;;  %p2175_p13 = scmp.lt.s32.totalorder %s1775_s30, %s1775_s30 }
 0x965   :  { %v1396_v24 = vsel %vm238_vm2, %v2049_v32, 0.0  ;;  %v1591_v48 = vpop.permute.xlu1 %1590  ;;  %p2171_p12 = scmp.ne.s32.totalorder %s1775_s30, %s2170_s16  ;;  %p2176_p0 = scmp.lt.s32.totalorder %s2170_s16, %s2170_s16 }
 0x966   :  { %1397 = vadd.xlane.f32.xlu0 %v1396_v24  ;;  %v1611_v54 = vsel %vm238_vm2, %v2475_v58, %v1591_v48 }
 0x967   :  { %p2177_p1 = por %p2176_p0, %p2175_p13 }
 0x968   :  { %v2051_v25 = vpop.eup %2050 }
 0x969   :  { %v1399_v27 = vsel %vm238_vm2, %v2051_v25, 0.0  ;;  %v1599_v18 = vpop.permute.xlu1 %1598  ;;  %p2178_p2 = pnand %p2177_p1, %p2171_p12 }
 0x96a   :  { %1400 = vadd.xlane.f32.xlu0 %v1399_v27  ;;  %v1613_v55 = vsel %vm1578_vm4, %v1611_v54, %v1599_v18 }
 0x980   :  { %1482 = vrot.lane.b32.xlu0 %v2439_v33, %s2243_s23  ;;  %v1617_v33 = vld [vmem:[#allocation10 + $0x8] sm:$0xff] }
 0x981   :  { %v1992_v39 = vpack.c.bf16 %v1617_v33, %v1616_v38 }
 0x983   :  { %1993 = vmatprep.subr.bf16.mxu0 %v1992_v39 }
 0x984   :  { %1596 = vrot.lane.b32.xlu0 %v1148_v1, %s2244_s24 }
 0x9f3   :  { %v1398_v29 = vpop.xlane.xlu0 %1397 }
 0x9f4   :  { %2052 = vrcp.f32 %v1398_v29 }
 0x9f7   :  { %v1401_v30 = vpop.xlane.xlu0 %1400 }
 0x9f8   :  { %2054 = vrcp.f32 %v1401_v30 }
 0x9fb   :  { %v1483_v31 = vpop.permute.xlu0 %1482 }
 0x9fc   :  { %1969 = vmatpush3.msra.mxu1 %v1483_v31 }
 0x9fe   :  { %v2053_v34 = vpop.eup %2052 }
 0x9ff   :  { %v2561_v35 = vmul.f32 %v2053_v34, %v2049_v32  ;;  %v1597_v49 = vpop.permute.xlu0 %1596 }
 0xa00   :  { %v1612_v19 = vsel %vm1578_vm4, %v1610_v50, %v1597_v49 }
 0xa01   :  { %1966 = vmatmul.mubr.msk.f32.vlgmr.msra.gmra.mrb[14].mxu0 %vm238_vm2, %v2561_v35 }
 0xa02   :  { %v2055_v36 = vpop.eup %2054  ;;  %1995 = vmatpush3.bf16.msra.mxu0 %v1992_v39 }
 0xa03   :  { %v1405_v37 = vmul.f32 %v2055_v36, %v2051_v25  ;;  %1997 = vmatprep.subr.bf16.mxu0 %v1996_v42 }
 0xa05   :  { %1971 = vmatmul.mubr.msk.f32.vlgmr.msra.gmra.mrb[20].mxu1 %vm238_vm2, %v1405_v37 }
 0xa06   :  { %1999 = vmatpush3.bf16.msra.mxu0 %v1996_v42 }
 0xad4   :  { %v1478_v43 = vpop.f32.mrb[14].mxu0 }
 0xad5   :  { %1604 = vrot.lane.b32.xlu0 %v1478_v43, %s2245_s27  ;;  %v1967_v44 = vpop.f32.mrb[15].mxu0 }
 0xad8   :  { %v1554_v45 = vpop.f32.mrb[20].mxu1 }
 0xad9   :  { %1606 = vrot.lane.b32.xlu1 %v1554_v45, %s2245_s27  ;;  %v1972_v46 = vpop.f32.mrb[21].mxu1 }
 0xb47   :  { %v1605_v23 = vpop.permute.xlu0 %1604 }
 0xb48   :  { %v1614_v52 = vsel %vm1581_vm3, %v1612_v19, %v1605_v23 }
 0xb49   :  { %1981 = vmatprep.mubr.msk.f32.mxu0 %vm121_vm0, %v1614_v52 }
 0xb4b   :  { %v1607_v57 = vpop.permute.xlu1 %1606 }
 0xb4c   :  { %v1615_v59 = vsel %vm1581_vm3, %v1613_v55, %v1607_v57 }
 0xb4d   :  { %1982 = vmatmul.mubr.msk.f32.vlgmr.msra.gmra.mrb[16].mxu0 %vm121_vm0, %v1615_v59 }
 0xc20   :  { %v1983_v61 = vpop.f32.mrb[16].mxu0 }
 0xc21   :  { %v1705_v62 = vadd.f32 %v1983_v61, %v1823_v56  ;;  %v1699_v21 = vpop.f32.mrb[17].mxu0 }
 0xc22   :  { %v1700_v0 = vadd.f32 %v1823_v56, %v1699_v21 }
 0xc23   :  { %v1709_v1 = vadd.f32 %v1705_v62, %v2396_v7 }
 0xc24   :  { %v1708_v2 = vadd.f32 %v1700_v0, %v2392_v5 }
 0xc25   :  { %v1713_v58 = vsel %vm121_vm0, %v1709_v1, 0.0 }
 0xc26   :  { %1714 = vadd.xlane.f32.xlu1 %v1713_v58  ;;  %v1710_v3 = vsel %vm121_vm0, %v1708_v2, 0.0 }
 0xc27   :  { %1711 = vadd.xlane.f32.xlu0 %v1710_v3 }
 0xc37   :  { %1558 = vrot.lane.b32.xlu1 %v2489_v26, %s2227_s26 }
 0xc3b   :  { %1564 = vrot.lane.b32.xlu1 %v2527_v60, %s2244_s24 }
 0xc3f   :  { %1566 = vrot.lane.b32.xlu1 %v2534_v63, %s2244_s24 }
 0xc43   :  { %1572 = vrot.lane.b32.xlu1 %v1405_v37, %s2245_s27 }
 0xcb3   :  { %v1715_v7 = vpop.xlane.xlu1 %1714 }
 0xcb4   :  { %v1718_v4 = vmul.f32 0.03125, %v1715_v7  ;;  %v1712_v5 = vpop.xlane.xlu0 %1711 }
 0xcb5   :  { %v1717_v6 = vmul.f32 0.03125, %v1712_v5 }
 0xcb6   :  { %v1720_v8 = vsub.f32 %v1709_v1, %v1718_v4 }
 0xcb7   :  { %v1719_v9 = vsub.f32 %v1708_v2, %v1717_v6  ;;  %v1559_v60 = vpop.permute.xlu1 %1558 }
 0xcb8   :  { %v1722_v11 = vmul.f32 %v1720_v8, %v1720_v8  ;;  %v1576_v27 = vsel %vm238_vm2, %v2450_v51, %v1559_v60 }
 0xcb9   :  { %v1721_v13 = vmul.f32 %v1719_v9, %v1719_v9 }
 0xcba   :  { %v1726_v12 = vsel %vm121_vm0, %v1722_v11, 0.0 }
 0xcbb   :  { %1727 = vadd.xlane.f32.xlu0 %v1726_v12  ;;  %v1723_v26 = vsel %vm121_vm0, %v1721_v13, 0.0  ;;  %v1565_v63 = vpop.permute.xlu1 %1564 }
 0xcbc   :  { %v1579_v30 = vsel %vm1578_vm4, %v1576_v27, %v1565_v63 }
 0xcbf   :  { %1724 = vadd.xlane.f32.xlu0 %v1723_v26  ;;  %v1567_v16 = vpop.permute.xlu1 %1566 }
 0xcd5   :  { %1560 = vrot.lane.b32.xlu0 %v2496_v28, %s2227_s26  ;;  %v1573_v28 = vpop.permute.xlu1 %1572 }
 0xcd9   :  { %1570 = vrot.lane.b32.xlu0 %v2561_v35, %s2245_s27 }
 0xd48   :  { %v1728_v10 = vpop.xlane.xlu0 %1727 }
 0xd49   :  { %v1730_v14 = vmul.f32 0.03125, %v1728_v10 }
 0xd4b   :  { %v1732_v15 = vadd.f32 1e-05, %v1730_v14 }
 0xd4c   :  { %v1725_v17 = vpop.xlane.xlu0 %1724 }
 0xd4d   :  { %2056 = vrsqrt.f32 %v1732_v15  ;;  %v1729_v20 = vmul.f32 0.03125, %v1725_v17 }
 0xd4f   :  { %v1731_v22 = vadd.f32 1e-05, %v1729_v20 }
 0xd50   :  { %v1561_v32 = vpop.permute.xlu0 %1560 }
 0xd51   :  { %2058 = vrsqrt.f32 %v1731_v22  ;;  %v1577_v24 = vsel %vm238_vm2, %v2456_v53, %v1561_v32  ;;  %v1826_v53 = vld [vmem:[%s2653_s7] ss:$0 sm:$0xff] }
 0xd52   :  { %v1580_v25 = vsel %vm1578_vm4, %v1577_v24, %v1567_v16 }
 0xd53   :  { %v1583_v29 = vsel %vm1581_vm3, %v1580_v25, %v1573_v28 }
 0xd54   :  { %v1571_v31 = vpop.permute.xlu0 %1570  ;;  %1585 = vst.msk [vmem:[#allocation12 + $0x8] sm:$0xff] %vm121_vm0, %v1583_v29 }
 0xd55   :  { %v1582_v34 = vsel %vm1581_vm3, %v1579_v30, %v1571_v31 }
 0xd56   :  { %1584 = vst.msk [vmem:[#allocation12] sm:$0xff] %vm121_vm0, %v1582_v34 }
 0xd57   :  { %v2057_v35 = vpop.eup %2056 }
 0xd58   :  { %2181 = shalt.err (!%p2178_p2)
}
 0xd59   :  { %s2182_s22 = scalar_lea.hbm %s2656_s10, 256 }
 0xd5a   :  { %p2183_p3 = scmp.ne.s32.totalorder %s2656_s10, %s2182_s22  ;;  %p2186_p4 = scmp.lt.u32.totalorder %s2182_s22, %s2656_s10 }
 0xd5c   :  { %p2188_p5 = pnand %p2186_p4, %p2183_p3 }
 0xd5e   :  { %2191 = shalt.err (!%p2188_p5)
}
 0xd5f   :  { %1780 = dma.vmem_to_hbm [thread:$0]  %s1775_s30, 256, %s2656_s10, [#allocation13], %s2226_s25, %s2226_s25, %s2227_s26   ;;  %v1736_v51 = vmul.f32 %v2057_v35, %v1720_v8  ;;  %v2059_v38 = vpop.eup %2058 }
 0xd60   :  { %v1827_v36 = vld [vmem:[%s2654_s8] ss:$0 sm:$0xff]  ;;  %v1735_v33 = vmul.f32 %v2059_v38, %v1719_v9  ;;  %s2247_s14 = smov [#allocation11]  }
 0xd61   :  { %v1745_v37 = vmul.f32 %v1826_v53, %v1736_v51  ;;  %s1762_s19 = sshll.u32 %s2247_s14, 4  ;;  %s1763_s19 = int_to_ptr.vmem [resolvable:$true] %s1762_s19 }
 0xd62   :  { %v1744_v40 = vmul.f32 %v1826_v53, %v1735_v33  ;;  %s2192_s21 = scalar_lea.vmem %s1763_s19, 256  ;;  %p2197_p7 = scmp.lt.s32.totalorder %s1763_s19, %s1763_s19 }
 0xd63   :  { %v1754_v39 = vadd.f32 %v1827_v36, %v1745_v37  ;;  %p2193_p6 = scmp.ne.s32.totalorder %s1763_s19, %s2192_s21  ;;  %p2198_p8 = scmp.lt.s32.totalorder %s2192_s21, %s2192_s21 }
 0xd64   :  { %v1753_v41 = vadd.f32 %v1827_v36, %v1744_v40 }
 0xd65   :  { %1756 = vst.msk [vmem:[#allocation11 + $0x8] sm:$0xff] %vm121_vm0, %v1754_v39  ;;  %p2199_p9 = por %p2198_p8, %p2197_p7 }
 0xd66   :  { %1755 = vst.msk [vmem:[#allocation11] sm:$0xff] %vm121_vm0, %v1753_v41 }
 0xd67   :  { %p2200_p10 = pnand %p2199_p9, %p2193_p6 }
 0xd69   :  { %2203 = shalt.err (!%p2200_p10)
}
 0xd6a   :  { %s2204_s0 = scalar_lea.hbm %s2655_s9, 256 }
 0xd6b   :  { %p2205_p11 = scmp.ne.s32.totalorder %s2655_s9, %s2204_s0  ;;  %p2208_p12 = scmp.lt.u32.totalorder %s2204_s0, %s2655_s9 }
 0xd6d   :  { %p2210_p13 = pnand %p2208_p12, %p2205_p11 }
 0xd6f   :  { %2213 = shalt.err (!%p2210_p13)
}
 0xd70   :  { %1768 = dma.vmem_to_hbm [thread:$0]  %s1763_s19, 256, %s2655_s9, [#allocation4], %s2226_s25, %s2226_s25, %s2227_s26  }
 0xd71   :  { %2220 = dma.done.wait [#allocation4], 256  }
 0xd72   :  { %2221 = vsyncadd [#allocation4], 4294967040 }
 0xd73   :  { %2222 = dma.done.wait [#allocation13], 256  }
 0xd74   :  { %2223 = vsyncadd [#allocation13], 4294967040 }
 0xd75   :  { %1787 = vsyncpa [#allocation3], 1 }
 0xd76   :  { %1788 = vsyncpa [#allocation6], 1 }
 0xd77   :  { %1789 = vsyncpa [#allocation9], 1 }
 0xd78   :  { %1790 = vsyncpa [#allocation4], 1 }
 0xd79   :  { %1791 = vsyncpa [#allocation13], 1 }

</bundles_post_ra>
